<compile_context>
chip_gen: v7x
topology: tpu7x:2x2x1
jax: 0.10.0
libtpu: 0.0.40
codegen_flags: <defaults>
</compile_context>

<pallas_src>
import jax
import jax.numpy as jnp
from jax.experimental import pallas as pl
from jax.experimental.pallas import tpu as pltpu

IN_DIM, H1, H2, OUT = 18, 20, 50, 3
LANE = 128      # lane width; batch tiles are multiples of this
CHUNK = 256     # lanes (= batch rows) processed per inner-loop chunk (register-resident)


def _round_up(x, m):
    return (x + m - 1) // m * m


# ----------------------------------------------------------------------------- TPU profile
_TPU_PROFILE = None


def _tpu_profile():
    """Generation-aware policy: tile cap, VMEM limit, and whether to try CORE_PARALLEL."""
    global _TPU_PROFILE
    if _TPU_PROFILE is None:
        try:
            vmem = int(pltpu.get_tpu_info().vmem_capacity_bytes)
            detected = True
        except Exception:
            vmem, detected = 0, False
        if not detected:
            # Unknown chip: conservative middle ground, plain "parallel" only.
            _TPU_PROFILE = dict(max_tile=4096, vmem_limit=48 << 20, core_parallel=False)
        elif vmem < (96 << 20):
            # v7x-like: 64 MiB VMEM per TC, 2 TensorCores -> smaller tiles, >=2 grid steps,
            # CORE_PARALLEL so the split actually lands on both cores.
            _TPU_PROFILE = dict(max_tile=2048, vmem_limit=40 << 20, core_parallel=True)
        else:
            # v5e/v6e: single TC, 128 MiB VMEM -> one big tile amortizes the ~0.35us/step cost.
            _TPU_PROFILE = dict(max_tile=8192, vmem_limit=64 << 20, core_parallel=False)
    return _TPU_PROFILE


# ----------------------------------------------------------------------------- kernel
def make_kernel(tile, chunk):
    n_chunks = tile // chunk

    def kernel(x_ref, w1_ref, b1_ref, w2_ref, b2_ref, w3_ref, b3_ref, o_ref):
        # x_ref: (18, tile); w*: (out, in); b*: (out, chunk); o_ref: (3, tile)
        def compute_chunk(col):
            xs = x_ref[:, pl.ds(col, chunk)]                                     # (18, chunk)
            h1 = jnp.maximum(
                jnp.dot(w1_ref[...], xs, preferred_element_type=jnp.float32) + b1_ref[...],
                0.0)                                                             # (20, chunk)
            h2 = jnp.maximum(
                jnp.dot(w2_ref[...], h1, preferred_element_type=jnp.float32) + b2_ref[...],
                0.0)                                                             # (50, chunk)
            logits = (jnp.dot(w3_ref[...], h2, preferred_element_type=jnp.float32)
                      + b3_ref[...])                                             # (3, chunk)
            # Softmax over the 3 class rows: explicit 3-way max/add on the VPU
            # (no XLU lane reductions), EUP reciprocal for the denominator.
            l0, l1, l2 = logits[0:1, :], logits[1:2, :], logits[2:3, :]
            m = jnp.maximum(jnp.maximum(l0, l1), l2)                             # (1, chunk)
            e = jnp.exp(logits - m)                                              # (3, chunk)
            denom = e[0:1, :] + e[1:2, :] + e[2:3, :]                            # (1, chunk)
            o_ref[:, pl.ds(col, chunk)] = e * pl.reciprocal(denom, approx=False)

        if n_chunks == 1:
            compute_chunk(0)
        else:
            def body(c, carry):
                compute_chunk(pl.multiple_of(c * chunk, chunk))
                return carry
            jax.lax.fori_loop(0, n_chunks, body, 0, unroll=True)

    return kernel


# ----------------------------------------------------------------------------- wrapper
def sdss_forward(x, params, *, max_tile=None):
    """x: (N, 18) f32.  params in PyTorch layout: W (out, in), b (out,).  Returns (N, 3)."""
    w1, b1, w2, b2, w3, b3 = params
    n = x.shape[0]
    prof = _tpu_profile()

    # --- batch tile (lane axis) policy ---
    if max_tile is None:
        target = (n + 1) // 2 if prof["core_parallel"] else n   # >=2 steps only if they land on 2 TCs
        tile = min(prof["max_tile"], _round_up(target, LANE))
    else:
        tile = min(_round_up(max_tile, LANE), _round_up(n, LANE))
    if tile > CHUNK:
        tile = _round_up(tile, CHUNK)          # inner chunk loop needs chunk | tile
    chunk = min(CHUNK, tile)

    n_pad = _round_up(n, tile)
    grid = (n_pad // tile,)

    # --- feature-major layout: batch on lanes; zero-pad batch to a lane-dense multiple ---
    x_t = jnp.asarray(x, jnp.float32).T                          # (18, N)
    if n_pad != n:
        x_t = jnp.pad(x_t, ((0, 0), (0, n_pad - n)))             # padded cols sliced off below

    # Weights stay in PyTorch (out, in) orientation; biases pre-broadcast to (out, chunk)
    # so the in-kernel add is a plain vreg add (no per-step broadcast_in_dim).
    w1 = jnp.asarray(w1, jnp.float32); w2 = jnp.asarray(w2, jnp.float32); w3 = jnp.asarray(w3, jnp.float32)
    b1c = jnp.broadcast_to(jnp.asarray(b1, jnp.float32).reshape(H1, 1), (H1, chunk))
    b2c = jnp.broadcast_to(jnp.asarray(b2, jnp.float32).reshape(H2, 1), (H2, chunk))
    b3c = jnp.broadcast_to(jnp.asarray(b3, jnp.float32).reshape(OUT, 1), (OUT, chunk))

    full = lambda r, c: pl.BlockSpec((r, c), lambda i: (0, 0))   # grid-invariant block (DMA'd once)

    def _call(semantics):
        return pl.pallas_call(
            make_kernel(tile, chunk),
            out_shape=jax.ShapeDtypeStruct((OUT, n_pad), jnp.float32),
            grid_spec=pltpu.PrefetchScalarGridSpec(
                num_scalar_prefetch=0,
                grid=grid,
                in_specs=[
                    pl.BlockSpec((IN_DIM, tile), lambda i: (0, i)),  # x tile: batch on lanes
                    full(H1, IN_DIM), full(H1, chunk),               # layer1 W, b
                    full(H2, H1),     full(H2, chunk),               # layer2 W, b
                    full(OUT, H2),    full(OUT, chunk),              # layer3 W, b
                ],
                out_specs=pl.BlockSpec((OUT, tile), lambda i: (0, i)),  # lane-dense output
            ),
            compiler_params=pltpu.CompilerParams(
                dimension_semantics=semantics,
                vmem_limit_bytes=prof["vmem_limit"]),
        )(x_t, w1, b1c, w2, b2c, w3, b3c)

    if prof["core_parallel"]:
        try:
            out_t = _call((pltpu.CORE_PARALLEL,))   # real 2-TC split on v7x
        except Exception:
            out_t = _call(("parallel",))            # safe fallback if lowering rejects
    else:
        out_t = _call(("parallel",))

    return out_t[:, :n].T                           # back to the (N, 3) contract


# ----------------------------------------------------------------------------- init / reference
def init_params(key):
    """Deterministic init mimicking torch.nn.Linear: W (out, in), b (out,), U(-1/sqrt(fan_in), ...)."""
    def linear_init(k, fan_in, fan_out):
        kw, kb = jax.random.split(k)
        bound = 1.0 / jnp.sqrt(float(fan_in))
        w = jax.random.uniform(kw, (fan_out, fan_in), jnp.float32, -bound, bound)
        b = jax.random.uniform(kb, (fan_out,), jnp.float32, -bound, bound)
        return w, b

    k1, k2, k3 = jax.random.split(key, 3)
    w1, b1 = linear_init(k1, IN_DIM, H1)
    w2, b2 = linear_init(k2, H1, H2)
    w3, b3 = linear_init(k3, H2, OUT)
    return (w1, b1, w2, b2, w3, b3)


def reference_forward(x, params):
    w1, b1, w2, b2, w3, b3 = params
    h1 = jnp.maximum(x @ w1.T + b1, 0.0)
    h2 = jnp.maximum(h1 @ w2.T + b2, 0.0)
    return jax.nn.softmax(h2 @ w3.T + b3, axis=1)


if __name__ == "__main__":
    key = jax.random.PRNGKey(0)
    kx, kp = jax.random.split(key)
    params = init_params(kp)

    # Test A: small batch, automatic tile policy (single grid step, single chunk).
    x = jax.random.normal(kx, (16, IN_DIM), jnp.float32)
    out = jax.block_until_ready(sdss_forward(x, params))
    ref = reference_forward(x, params)
    assert out.shape == (16, OUT)
    assert jnp.allclose(out, ref, atol=1e-5, rtol=1e-5), "mismatch vs reference (batch=16)"
    assert jnp.allclose(jnp.sum(out, axis=1), 1.0, atol=1e-5), "softmax rows must sum to 1"

    # Test B: ragged batch + forced small tile -> multiple grid steps (pipelining path).
    xb = jax.random.normal(jax.random.PRNGKey(1), (300, IN_DIM), jnp.float32)
    outb = jax.block_until_ready(sdss_forward(xb, params, max_tile=256))
    refb = reference_forward(xb, params)
    assert outb.shape == (300, OUT)
    assert jnp.allclose(outb, refb, atol=1e-5, rtol=1e-5), "mismatch vs reference (ragged batch)"

    # Test C: tile > chunk -> exercises the unrolled inner chunk loop + intra-tile padding.
    xc = jax.random.normal(jax.random.PRNGKey(2), (1000, IN_DIM), jnp.float32)
    outc = jax.block_until_ready(sdss_forward(xc, params, max_tile=1024))
    refc = reference_forward(xc, params)
    assert outc.shape == (1000, OUT)
    assert jnp.allclose(outc, refc, atol=1e-5, rtol=1e-5), "mismatch vs reference (multi-chunk)"

    print("KERNEL_OK")
</pallas_src>

<mosaic_0001>
module attributes {stable_mosaic.version = 11 : i64} {
  func.func @kernel(%arg0: i32, %arg1: memref<18x128xf32, #tpu.memory_space<vmem>>, %arg2: memref<20x18xf32, #tpu.memory_space<vmem>>, %arg3: memref<20x128xf32, #tpu.memory_space<vmem>>, %arg4: memref<50x20xf32, #tpu.memory_space<vmem>>, %arg5: memref<50x128xf32, #tpu.memory_space<vmem>>, %arg6: memref<3x50xf32, #tpu.memory_space<vmem>>, %arg7: memref<3x128xf32, #tpu.memory_space<vmem>>, %arg8: memref<3x128xf32, #tpu.memory_space<vmem>>) attributes {dimension_semantics = [#tpu.dimension_semantics<parallel>], iteration_bounds = array<i64: 1>, scalar_prefetch = 0 : i64, scratch_operands = 0 : i64, tpu.core_type = #tpu.core_type<tc>, window_params = [{transform_indices = @transform_0, window_bounds = array<i64: 18, 128>}, {pipeline_mode = #tpu.pipeline_mode<synchronous>, transform_indices = @transform_1, window_bounds = array<i64: 20, 18>}, {pipeline_mode = #tpu.pipeline_mode<synchronous>, transform_indices = @transform_2, window_bounds = array<i64: 20, 128>}, {pipeline_mode = #tpu.pipeline_mode<synchronous>, transform_indices = @transform_3, window_bounds = array<i64: 50, 20>}, {pipeline_mode = #tpu.pipeline_mode<synchronous>, transform_indices = @transform_4, window_bounds = array<i64: 50, 128>}, {pipeline_mode = #tpu.pipeline_mode<synchronous>, transform_indices = @transform_5, window_bounds = array<i64: 3, 50>}, {pipeline_mode = #tpu.pipeline_mode<synchronous>, transform_indices = @transform_6, window_bounds = array<i64: 3, 128>}, {transform_indices = @transform_7, window_bounds = array<i64: 3, 128>}]} {
    %c0 = arith.constant 0 : index
    %c0_0 = arith.constant 0 : index
    %0 = vector.load %arg1[%c0, %c0_0] : memref<18x128xf32, #tpu.memory_space<vmem>>, vector<18x128xf32>
    %c0_1 = arith.constant 0 : index
    %c0_2 = arith.constant 0 : index
    %1 = vector.load %arg2[%c0_1, %c0_2] : memref<20x18xf32, #tpu.memory_space<vmem>>, vector<20x18xf32>
    %cst = arith.constant dense<0.000000e+00> : vector<20x128xf32>
    %2 = tpu.matmul %1, %0, %cst {dimension_numbers = #tpu.dot_dimension_numbers<[1], [0], [0], [1], [0, 0, 1, 1], [], []>} : vector<20x18xf32>, vector<18x128xf32>, vector<20x128xf32> -> vector<20x128xf32>
    %c0_3 = arith.constant 0 : index
    %c0_4 = arith.constant 0 : index
    %3 = vector.load %arg3[%c0_3, %c0_4] : memref<20x128xf32, #tpu.memory_space<vmem>>, vector<20x128xf32>
    %4 = arith.addf %2, %3 : vector<20x128xf32>
    %cst_5 = arith.constant 0.000000e+00 : f32
    %5 = vector.broadcast %cst_5 : f32 to vector<20x128xf32>
    %6 = arith.maximumf %4, %5 : vector<20x128xf32>
    %c0_6 = arith.constant 0 : index
    %c0_7 = arith.constant 0 : index
    %7 = vector.load %arg4[%c0_6, %c0_7] : memref<50x20xf32, #tpu.memory_space<vmem>>, vector<50x20xf32>
    %cst_8 = arith.constant dense<0.000000e+00> : vector<50x128xf32>
    %8 = tpu.matmul %7, %6, %cst_8 {dimension_numbers = #tpu.dot_dimension_numbers<[1], [0], [0], [1], [0, 0, 1, 1], [], []>} : vector<50x20xf32>, vector<20x128xf32>, vector<50x128xf32> -> vector<50x128xf32>
    %c0_9 = arith.constant 0 : index
    %c0_10 = arith.constant 0 : index
    %9 = vector.load %arg5[%c0_9, %c0_10] : memref<50x128xf32, #tpu.memory_space<vmem>>, vector<50x128xf32>
    %10 = arith.addf %8, %9 : vector<50x128xf32>
    %cst_11 = arith.constant 0.000000e+00 : f32
    %11 = vector.broadcast %cst_11 : f32 to vector<50x128xf32>
    %12 = arith.maximumf %10, %11 : vector<50x128xf32>
    %c0_12 = arith.constant 0 : index
    %c0_13 = arith.constant 0 : index
    %13 = vector.load %arg6[%c0_12, %c0_13] : memref<3x50xf32, #tpu.memory_space<vmem>>, vector<3x50xf32>
    %cst_14 = arith.constant dense<0.000000e+00> : vector<3x128xf32>
    %14 = tpu.matmul %13, %12, %cst_14 {dimension_numbers = #tpu.dot_dimension_numbers<[1], [0], [0], [1], [0, 0, 1, 1], [], []>} : vector<3x50xf32>, vector<50x128xf32>, vector<3x128xf32> -> vector<3x128xf32>
    %c0_15 = arith.constant 0 : index
    %c0_16 = arith.constant 0 : index
    %15 = vector.load %arg7[%c0_15, %c0_16] : memref<3x128xf32, #tpu.memory_space<vmem>>, vector<3x128xf32>
    %16 = arith.addf %14, %15 : vector<3x128xf32>
    %17 = vector.extract_strided_slice %16 {offsets = [0, 0], sizes = [1, 128], strides = [1, 1]} : vector<3x128xf32> to vector<1x128xf32>
    %18 = vector.extract_strided_slice %16 {offsets = [1, 0], sizes = [1, 128], strides = [1, 1]} : vector<3x128xf32> to vector<1x128xf32>
    %19 = vector.extract_strided_slice %16 {offsets = [2, 0], sizes = [1, 128], strides = [1, 1]} : vector<3x128xf32> to vector<1x128xf32>
    %20 = arith.maximumf %17, %18 : vector<1x128xf32>
    %21 = arith.maximumf %20, %19 : vector<1x128xf32>
    %22 = vector.broadcast %21 : vector<1x128xf32> to vector<3x128xf32>
    %23 = arith.subf %16, %22 : vector<3x128xf32>
    %24 = math.exp %23 : vector<3x128xf32>
    %25 = vector.extract_strided_slice %24 {offsets = [0, 0], sizes = [1, 128], strides = [1, 1]} : vector<3x128xf32> to vector<1x128xf32>
    %26 = vector.extract_strided_slice %24 {offsets = [1, 0], sizes = [1, 128], strides = [1, 1]} : vector<3x128xf32> to vector<1x128xf32>
    %27 = arith.addf %25, %26 : vector<1x128xf32>
    %28 = vector.extract_strided_slice %24 {offsets = [2, 0], sizes = [1, 128], strides = [1, 1]} : vector<3x128xf32> to vector<1x128xf32>
    %29 = arith.addf %27, %28 : vector<1x128xf32>
    %30 = tpu.reciprocal %29 : vector<1x128xf32> -> vector<1x128xf32>
    %31 = vector.broadcast %30 : vector<1x128xf32> to vector<3x128xf32>
    %32 = arith.mulf %24, %31 : vector<3x128xf32>
    %c0_17 = arith.constant 0 : index
    %c0_18 = arith.constant 0 : index
    %33 = vector.load %arg8[%c0_17, %c0_18] : memref<3x128xf32, #tpu.memory_space<vmem>>, vector<3x128xf32>
    tpu.vector_store %arg8[%c0_17, %c0_18], %32 {strides = array<i32>} : memref<3x128xf32, #tpu.memory_space<vmem>>, vector<3x128xf32>,
    return
  }
  func.func @transform_0(%arg0: i32) -> (i32, i32) {
    %c0_i32 = arith.constant 0 : i32
    %c0_i32_0 = arith.constant 0 : i32
    return %c0_i32, %arg0 : i32, i32
  }
  func.func @transform_1(%arg0: i32) -> (i32, i32) {
    %c0_i32 = arith.constant 0 : i32
    %c0_i32_0 = arith.constant 0 : i32
    %c0_i32_1 = arith.constant 0 : i32
    return %c0_i32, %c0_i32_0 : i32, i32
  }
  func.func @transform_2(%arg0: i32) -> (i32, i32) {
    %c0_i32 = arith.constant 0 : i32
    %c0_i32_0 = arith.constant 0 : i32
    %c0_i32_1 = arith.constant 0 : i32
    return %c0_i32, %c0_i32_0 : i32, i32
  }
  func.func @transform_3(%arg0: i32) -> (i32, i32) {
    %c0_i32 = arith.constant 0 : i32
    %c0_i32_0 = arith.constant 0 : i32
    %c0_i32_1 = arith.constant 0 : i32
    return %c0_i32, %c0_i32_0 : i32, i32
  }
  func.func @transform_4(%arg0: i32) -> (i32, i32) {
    %c0_i32 = arith.constant 0 : i32
    %c0_i32_0 = arith.constant 0 : i32
    %c0_i32_1 = arith.constant 0 : i32
    return %c0_i32, %c0_i32_0 : i32, i32
  }
  func.func @transform_5(%arg0: i32) -> (i32, i32) {
    %c0_i32 = arith.constant 0 : i32
    %c0_i32_0 = arith.constant 0 : i32
    %c0_i32_1 = arith.constant 0 : i32
    return %c0_i32, %c0_i32_0 : i32, i32
  }
  func.func @transform_6(%arg0: i32) -> (i32, i32) {
    %c0_i32 = arith.constant 0 : i32
    %c0_i32_0 = arith.constant 0 : i32
    %c0_i32_1 = arith.constant 0 : i32
    return %c0_i32, %c0_i32_0 : i32, i32
  }
  func.func @transform_7(%arg0: i32) -> (i32, i32) {
    %c0_i32 = arith.constant 0 : i32
    %c0_i32_0 = arith.constant 0 : i32
    return %c0_i32, %arg0 : i32, i32
  }
}

</mosaic_0001>

<bundles_post_ra>
// kernel: tpu_custom_call.1
= control target key start
LH: loop header
LB: loop body
LE: loop exit
PB: predicated region body
PF: predicated region fallthrough
CT: control target
= control target key end

     0   :  { %12 = vsyncpa [#allocation3], 0  ;;  %s807_s0 = inlined_call_operand.vmem [shape: f32[18,128], index: 0, kind: input, shape index: {}]   ;;  %s808_s1 = inlined_call_operand.hbm [shape: f32[20,18], index: 1, kind: input, shape index: {}]   ;;  %s809_s2 = inlined_call_operand.hbm [shape: f32[20,128], index: 2, kind: input, shape index: {}]   ;;  %s810_s3 = inlined_call_operand.vmem [shape: f32[50,20], index: 3, kind: input, shape index: {}]   ;;  %s811_s4 = inlined_call_operand.vmem [shape: f32[50,128], index: 4, kind: input, shape index: {}]   ;;  %s812_s5 = inlined_call_operand.vmem [shape: f32[3,50], index: 5, kind: input, shape index: {}]   ;;  %s813_s6 = inlined_call_operand.vmem [shape: f32[3,128], index: 6, kind: input, shape index: {}]   ;;  %s814_s7 = inlined_call_operand.hbm [shape: f32[3,128], index: 7, kind: output, shape index: {}]  }
   0x1   :  { %13 = vsyncpa [#allocation6], 0 }
   0x2   :  { %14 = vsyncpa [#allocation4], 0  ;;  %s627_s24 = smov [#allocation2]   ;;  %s555_s28 = scalar_lea.hbm %s808_s1, 384 }
   0x3   :  { %s22_s25 = sshll.u32 %s627_s24, 4  ;;  %p556_p0 = scmp.ne.s32.totalorder %s808_s1, %s555_s28  ;;  %s23_s25 = int_to_ptr.vmem [resolvable:$true] %s22_s25 }
   0x4   :  { %p559_p1 = scmp.lt.u32.totalorder %s555_s28, %s808_s1 }
   0x6   :  { %p561_p2 = pnand %p559_p1, %p556_p0 }
   0x8   :  { %564 = shalt.err (!%p561_p2)
}
   0x9   :  { %s565_s10 = scalar_lea.vmem %s23_s25, 384  ;;  %p570_p4 = scmp.lt.s32.totalorder %s23_s25, %s23_s25 }
   0xa   :  { %p566_p3 = scmp.ne.s32.totalorder %s23_s25, %s565_s10  ;;  %p571_p5 = scmp.lt.s32.totalorder %s565_s10, %s565_s10 }
   0xc   :  { %p572_p6 = por %p571_p5, %p570_p4 }
   0xe   :  { %p573_p7 = pnand %p572_p6, %p566_p3 }
  0x10   :  { %576 = shalt.err (!%p573_p7)
}
  0x11   :  { %s628_s11 = smov 128   ;;  %s629_s12 = smov 8  }
  0x12   :  { %28 = dma.hbm_to_vmem [thread:$0]  %s808_s1, 384, %s23_s25, [#allocation3], %s628_s11, %s628_s11, %s629_s12  }
  0x13   :  { %s630_s15 = smov [#allocation5]   ;;  %s577_s19 = scalar_lea.hbm %s809_s2, 384 }
  0x14   :  { %s34_s16 = sshll.u32 %s630_s15, 4  ;;  %p578_p8 = scmp.ne.s32.totalorder %s809_s2, %s577_s19  ;;  %s35_s16 = int_to_ptr.vmem [resolvable:$true] %s34_s16 }
  0x15   :  { %p581_p9 = scmp.lt.u32.totalorder %s577_s19, %s809_s2 }
  0x17   :  { %p583_p10 = pnand %p581_p9, %p578_p8 }
  0x19   :  { %586 = shalt.err (!%p583_p10)
}
  0x1a   :  { %s587_s24 = scalar_lea.vmem %s35_s16, 384  ;;  %p592_p12 = scmp.lt.s32.totalorder %s35_s16, %s35_s16 }
  0x1b   :  { %p588_p11 = scmp.ne.s32.totalorder %s35_s16, %s587_s24  ;;  %p593_p13 = scmp.lt.s32.totalorder %s587_s24, %s587_s24 }
  0x1d   :  { %p594_p0 = por %p593_p13, %p592_p12 }
  0x1f   :  { %p595_p1 = pnand %p594_p0, %p588_p11 }
  0x21   :  { %598 = shalt.err (!%p595_p1)
}
  0x22   :  { %40 = dma.hbm_to_vmem [thread:$0]  %s809_s2, 384, %s35_s16, [#allocation6], %s628_s11, %s628_s11, %s629_s12  }
  0x23   :  { %621 = dma.done.wait [#allocation3], 384  }
  0x24   :  { %622 = vsyncadd [#allocation3], 4294966912 }
  0x25   :  { %623 = dma.done.wait [#allocation6], 384  }
  0x26   :  { %624 = vsyncadd [#allocation6], 4294966912  ;;  %v631_v0 = vmov 0.0|0.0   ;;  %vm632_vm0 = vmmov 0   ;;  %v633_v1 = vmov 0.0   ;;  %v55_v2 = vld [vmem:[%s807_s0] sm:$0xff] }
  0x27   :  { %528 = vmatprep.subr.bf16.mxu0 %v631_v0  ;;  %475 = vmatprep.mubr.msk.f32.mxu0 %vm632_vm0, %v633_v1  ;;  %v56_v3 = vld [vmem:[%s807_s0 + $0x8] sm:$0xff]  ;;  %v57_v5 = vld [vmem:[%s807_s0 + $0x10] sm:$0x3]  ;;  %vm74_vm1 = vcmask 1041408   ;;  %v58_v6 = vld [vmem:[#allocation2] sm:$0xff]  ;;  %vm64_vm2 = vcmask 146432  }
  0x28   :  { %531 = vmatprep.subr.bf16.mxu1 %v631_v0  ;;  %490 = vmatprep.mubr.msk.f32.mxu1 %vm632_vm0, %v633_v1  ;;  %v529_v4 = vpack.c.bf16 %v56_v3, %v55_v2  ;;  %v59_v7 = vld [vmem:[#allocation2 + $0x8] sm:$0xff]  ;;  %v60_v8 = vld [vmem:[#allocation2 + $0x10] sm:$0xf]  ;;  %v61_v9 = vld [vmem:[#allocation5] sm:$0xff]  ;;  %vm197_vm3 = vcmask 1043456   ;;  %vm175_vm4 = vcmask 162816  }
  0x29   :  { %v62_v12 = vld [vmem:[#allocation5 + $0x8] sm:$0xff]  ;;  %v63_v17 = vld [vmem:[#allocation5 + $0x10] sm:$0xf]  ;;  %v163_v27 = vld [vmem:[%s810_s3 + $0x10] sm:$0xff]  ;;  %vm310_vm5 = vcmask 408576  }
  0x2a   :  { %530 = vmatpush3.bf16.msra.mxu0 %v529_v4  ;;  %v161_v25 = vld [vmem:[%s810_s3] sm:$0xff]  ;;  %v162_v26 = vld [vmem:[%s810_s3 + $0x8] sm:$0xff]  ;;  %v164_v28 = vld [vmem:[%s810_s3 + $0x18] sm:$0xff] }
  0x2b   :  { %473 = vmatprep.subr.mxu0 %v633_v1  ;;  %v165_v29 = vld [vmem:[%s810_s3 + $0x20] sm:$0xff]  ;;  %v166_v30 = vld [vmem:[%s810_s3 + $0x28] sm:$0xff]  ;;  %v167_v31 = vld [vmem:[%s810_s3 + $0x30] sm:$0x3] }
  0x2c   :  { %v168_v32 = vld [vmem:[%s811_s4] sm:$0xff]  ;;  %v169_v35 = vld [vmem:[%s811_s4 + $0x8] sm:$0xff]  ;;  %v170_v42 = vld [vmem:[%s811_s4 + $0x10] sm:$0xff] }
  0x2d   :  { %v171_v46 = vld [vmem:[%s811_s4 + $0x18] sm:$0xff]  ;;  %v172_v53 = vld [vmem:[%s811_s4 + $0x20] sm:$0xff]  ;;  %v173_v57 = vld [vmem:[%s811_s4 + $0x28] sm:$0xff] }
  0x2e   :  { %474 = vmatpush3.msk.msra.mxu0 %vm74_vm1, %v57_v5  ;;  %v174_v62 = vld [vmem:[%s811_s4 + $0x30] sm:$0x3] }
  0x2f   :  { %476 = vmatmul.mubr.msk.f32.vlgmr.msra.gmra.mrb[0].mxu0 %vm64_vm2, %v58_v6  ;;  %534 = vmatprep.subr.bf16.mxu0 %v631_v0 }
  0x30   :  { %478 = vmatprep.mubr.msk.f32.mxu0 %vm632_vm0, %v633_v1 }
  0x33   :  { %479 = vmatmul.mubr.msk.f32.gmra.mrb[2].mxu0 %vm64_vm2, %v59_v7 }
  0x34   :  { %481 = vmatprep.mubr.msk.f32.mxu0 %vm632_vm0, %v633_v1 }
  0x37   :  { %482 = vmatmul.mubr.msk.f32.gmra.mrb[4].mxu0 %vm64_vm2, %v60_v8  ;;  %v394_v8 = vlaneseq }
  0x38   :  { %525 = vmatprep.mubr.msk.f32.mxu0 %vm632_vm0, %v633_v1 }
 0x102   :  { %v144_v10 = vpop.f32.mrb[0].mxu0 }
 0x103   :  { %v477_v11 = vpop.f32.mrb[1].mxu0  ;;  %v145_v13 = vadd.f32 %v144_v10, %v61_v9  ;;  %v309_v9 = vld [vmem:[%s813_s6] sm:$0x7] }
 0x105   :  { %v158_v18 = vmax.f32 %v145_v13, 0.0  ;;  %v395_v13 = vshrl.u32 %v394_v8, 7 }
 0x106   :  { %v149_v14 = vpop.f32.mrb[2].mxu0 }
 0x107   :  { %v150_v15 = vadd.f32 %v149_v14, %v62_v12  ;;  %v480_v16 = vpop.f32.mrb[3].mxu0 }
 0x108   :  { %v396_v16 = vsub.s32 0, %v395_v13 }
 0x109   :  { %v159_v19 = vmax.f32 %v150_v15, 0.0 }
 0x10a   :  { %v154_v20 = vpop.f32.mrb[4].mxu0 }
 0x10b   :  { %v155_v21 = vadd.f32 %v154_v20, %v63_v17  ;;  %v483_v22 = vpop.f32.mrb[5].mxu0  ;;  %v532_v23 = vpack.c.bf16 %v159_v19, %v158_v18 }
 0x10d   :  { %v160_v24 = vmax.f32 %v155_v21, 0.0  ;;  %533 = vmatpush3.bf16.msra.mxu1 %v532_v23 }
 0x10e   :  { %488 = vmatprep.subr.mxu1 %v633_v1 }
 0x111   :  { %489 = vmatpush3.msk.msra.mxu1 %vm197_vm3, %v160_v24 }
 0x112   :  { %491 = vmatmul.mubr.msk.f32.vlgmr.msra.gmra.mrb[0].mxu1 %vm175_vm4, %v161_v25 }
 0x113   :  { %493 = vmatprep.mubr.msk.f32.mxu1 %vm632_vm0, %v633_v1 }
 0x116   :  { %494 = vmatmul.mubr.msk.f32.gmra.mrb[2].mxu1 %vm175_vm4, %v162_v26 }
 0x117   :  { %496 = vmatprep.mubr.msk.f32.mxu1 %vm632_vm0, %v633_v1 }
 0x11a   :  { %497 = vmatmul.mubr.msk.f32.gmra.mrb[4].mxu1 %vm175_vm4, %v163_v27 }
 0x11b   :  { %499 = vmatprep.mubr.msk.f32.mxu1 %vm632_vm0, %v633_v1 }
 0x11e   :  { %500 = vmatmul.mubr.msk.f32.gmra.mrb[6].mxu1 %vm175_vm4, %v164_v28 }
 0x11f   :  { %502 = vmatprep.mubr.msk.f32.mxu1 %vm632_vm0, %v633_v1 }
 0x122   :  { %503 = vmatmul.mubr.msk.f32.gmra.mrb[8].mxu1 %vm175_vm4, %v165_v29 }
 0x123   :  { %505 = vmatprep.mubr.msk.f32.mxu1 %vm632_vm0, %v633_v1 }
 0x126   :  { %506 = vmatmul.mubr.msk.f32.gmra.mrb[10].mxu1 %vm175_vm4, %v166_v30 }
 0x127   :  { %508 = vmatprep.mubr.msk.f32.mxu1 %vm632_vm0, %v633_v1 }
 0x12a   :  { %509 = vmatmul.mubr.msk.f32.gmra.mrb[12].mxu1 %vm175_vm4, %v167_v31 }
 0x1e5   :  { %v267_v33 = vpop.f32.mrb[0].mxu1 }
 0x1e6   :  { %v492_v34 = vpop.f32.mrb[1].mxu1  ;;  %v268_v36 = vadd.f32 %v267_v33, %v168_v32 }
 0x1e8   :  { %v301_v40 = vmax.f32 %v268_v36, 0.0 }
 0x1e9   :  { %v272_v37 = vpop.f32.mrb[2].mxu1 }
 0x1ea   :  { %v273_v38 = vadd.f32 %v272_v37, %v169_v35  ;;  %v495_v39 = vpop.f32.mrb[3].mxu1 }
 0x1ec   :  { %v302_v41 = vmax.f32 %v273_v38, 0.0 }
 0x1ed   :  { %v277_v43 = vpop.f32.mrb[4].mxu1 }
 0x1ee   :  { %v535_v44 = vpack.c.bf16 %v302_v41, %v301_v40  ;;  %v498_v45 = vpop.f32.mrb[5].mxu1  ;;  %v278_v47 = vadd.f32 %v277_v43, %v170_v42 }
 0x1f0   :  { %536 = vmatpush3.bf16.msra.mxu0 %v535_v44  ;;  %v303_v51 = vmax.f32 %v278_v47, 0.0 }
 0x1f1   :  { %v282_v48 = vpop.f32.mrb[6].mxu1  ;;  %537 = vmatprep.subr.bf16.mxu0 %v631_v0 }
 0x1f2   :  { %v283_v49 = vadd.f32 %v282_v48, %v171_v46  ;;  %v501_v50 = vpop.f32.mrb[7].mxu1 }
 0x1f4   :  { %v304_v52 = vmax.f32 %v283_v49, 0.0 }
 0x1f5   :  { %v287_v54 = vpop.f32.mrb[8].mxu1 }
 0x1f6   :  { %v538_v55 = vpack.c.bf16 %v304_v52, %v303_v51  ;;  %v504_v56 = vpop.f32.mrb[9].mxu1  ;;  %v288_v58 = vadd.f32 %v287_v54, %v172_v53 }
 0x1f8   :  { %539 = vmatpush3.bf16.msra.mxu0 %v538_v55  ;;  %v305_v63 = vmax.f32 %v288_v58, 0.0 }
 0x1f9   :  { %v292_v59 = vpop.f32.mrb[10].mxu1  ;;  %540 = vmatprep.subr.bf16.mxu0 %v631_v0  ;;  %v308_v0 = vld [vmem:[%s812_s5] sm:$0x7]  ;;  %s634_s5 = smov [#allocation7]  }
 0x1fa   :  { %v293_v60 = vadd.f32 %v292_v59, %v173_v57  ;;  %v507_v61 = vpop.f32.mrb[11].mxu1  ;;  %s421_s6 = sshll.u32 %s634_s5, 4  ;;  %s422_s6 = int_to_ptr.vmem [resolvable:$true] %s421_s6 }
 0x1fb   :  { %s599_s11 = scalar_lea.vmem %s422_s6, 64  ;;  %p604_p3 = scmp.lt.s32.totalorder %s422_s6, %s422_s6 }
 0x1fc   :  { %v306_v2 = vmax.f32 %v293_v60, 0.0  ;;  %p600_p2 = scmp.ne.s32.totalorder %s422_s6, %s599_s11  ;;  %p605_p4 = scmp.lt.s32.totalorder %s599_s11, %s599_s11 }
 0x1fd   :  { %v297_v3 = vpop.f32.mrb[12].mxu1 }
 0x1fe   :  { %v541_v4 = vpack.c.bf16 %v306_v2, %v305_v63  ;;  %v298_v5 = vadd.f32 %v297_v3, %v174_v62  ;;  %v510_v6 = vpop.f32.mrb[13].mxu1  ;;  %p606_p5 = por %p605_p4, %p604_p3 }
 0x200   :  { %v307_v7 = vmax.f32 %v298_v5, 0.0  ;;  %542 = vmatpush3.bf16.msra.mxu0 %v541_v4  ;;  %p607_p6 = pnand %p606_p5, %p600_p2 }
 0x201   :  { %523 = vmatprep.subr.mxu0 %v633_v1 }
 0x204   :  { %524 = vmatpush3.msk.msra.mxu0 %vm74_vm1, %v307_v7 }
 0x205   :  { %526 = vmatmul.mubr.msk.f32.vlgmr.msra.gmra.mrb[6].mxu0 %vm310_vm5, %v308_v0 }
 0x2d8   :  { %v383_v10 = vpop.f32.mrb[6].mxu0 }
 0x2d9   :  { %v384_v11 = vadd.f32 %v383_v10, %v309_v9  ;;  %v527_v12 = vpop.f32.mrb[7].mxu0 }
 0x2db   :  { %v388_v14 = vrot.slane %v384_v11, 1  ;;  %v391_v1 = vrot.slane %v384_v11, 2 }
 0x2dd   :  { %v390_v15 = vmax.f32 %v384_v11, %v388_v14 }
 0x2df   :  { %v393_v17 = vmax.f32 %v390_v15, %v391_v1 }
 0x2e1   :  { %v397_v18 = vrot.slane %v393_v17, %v396_v16 }
 0x2e3   :  { %v398_v19 = vsub.f32 %v384_v11, %v397_v18 }
 0x2e5   :  { %v399_v20 = vmul.f32 1.442695, %v398_v19 }
 0x2e7   :  { %551 = vpow2.f32 %v399_v20 }
 0x2f1   :  { %v552_v21 = vpop.eup %551 }
 0x2f2   :  { %v402_v22 = vrot.slane %v552_v21, 1  ;;  %v405_v24 = vrot.slane %v552_v21, 2 }
 0x2f4   :  { %v404_v23 = vadd.f32 %v552_v21, %v402_v22 }
 0x2f6   :  { %v407_v25 = vadd.f32 %v405_v24, %v404_v23 }
 0x2f8   :  { %553 = vrcp.f32 %v407_v25 }
 0x302   :  { %v554_v26 = vpop.eup %553 }
 0x303   :  { %v412_v27 = vrot.slane %v554_v26, %v396_v16 }
 0x305   :  { %v413_v28 = vmul.f32 %v552_v21, %v412_v27 }
 0x307   :  { %414 = vst [vmem:[#allocation7] sm:$0x7] %v413_v28 }
 0x308   :  { %610 = shalt.err (!%p607_p6)
}
 0x309   :  { %s611_s14 = scalar_lea.hbm %s814_s7, 64 }
 0x30a   :  { %p612_p7 = scmp.ne.s32.totalorder %s814_s7, %s611_s14  ;;  %p615_p8 = scmp.lt.u32.totalorder %s611_s14, %s814_s7 }
 0x30c   :  { %p617_p9 = pnand %p615_p8, %p612_p7 }
 0x30e   :  { %620 = shalt.err (!%p617_p9)
}
 0x30f   :  { %424 = dma.vmem_to_hbm [thread:$0]  %s422_s6, 64, %s814_s7, [#allocation4]  }
 0x310   :  { %625 = dma.done.wait [#allocation4], 64  }
 0x311   :  { %626 = vsyncadd [#allocation4], 4294967232 }
 0x312   :  { %428 = vsyncpa [#allocation3], 1 }
 0x313   :  { %429 = vsyncpa [#allocation6], 1 }
 0x314   :  { %430 = vsyncpa [#allocation4], 1 }

</bundles_post_ra>
